<compile_context>
chip_gen: v7x
topology: tpu7x:2x2x1
jax: 0.10.0
libtpu: 0.0.40
codegen_flags: <defaults>
</compile_context>

<pallas_src>
import functools

import jax
import jax.numpy as jnp
from jax.experimental import pallas as pl
from jax.experimental.pallas import tpu as pltpu


# ---------------------------------------------------------------------------
# Constants / helpers
# ---------------------------------------------------------------------------

# Contract x:(m, k) with w:(n, k) (PyTorch nn.Linear weight layout) -> (m, n),
# i.e. x @ w.T without materializing the transpose.
# TODO(synk): verify via pl.lower_as_mlir that this NT contraction does not
# trigger a per-K-step in-kernel relayout of the weight tile (esp. on the bf16
# packed path); if it does, pre-transpose the weight once outside the kernel.
_NT_DIMS = (((1,), (1,)), ((), ()))

_VMEM = pltpu.MemorySpace.VMEM
_MIB = 1024 * 1024
_LANE = 128
_SUBLANE = 8

# Problems whose *entire* operand set fits comfortably in one VMEM block skip
# the grid (no pipeline prologue/epilogue, no per-step overhead).
_SINGLE_BLOCK_MAX_BYTES = 12 * _MIB


def _round_up(x, m):
    return ((x + m - 1) // m) * m


def _cdiv(a, b):
    return -(-a // b)


def _physical_vmem_bytes():
    """Trace-time chip query with a safe (v7x-sized) fallback."""
    try:
        info = pltpu.get_tpu_info()
        v = getattr(info, "vmem_capacity_bytes", None)
        if v:
            return int(v)
    except Exception:
        pass
    return 64 * _MIB  # v7x is the smallest-VMEM generation


def _footprint_bytes(tm, tn, tk, in_bytes):
    """Estimated VMEM footprint of the tiled kernel (double-buffered)."""
    return (2 * (tm + tn) * tk * in_bytes   # x & weight tiles (pipelined)
            + 2 * tm * tn * 4               # resident f32 output tile
            + 2 * tn * 4)                   # bias tile


# ---------------------------------------------------------------------------
# Kernels
# ---------------------------------------------------------------------------

def _single_block_kernel(x_ref, w_ref, b_ref, o_ref):
    # x_ref: (B, D_in), w_ref: (D_out, D_in), b_ref: (1, D_out) -> o: (B, D_out)
    acc = jax.lax.dot_general(x_ref[...], w_ref[...],
                              dimension_numbers=_NT_DIMS,
                              preferred_element_type=jnp.float32)
    o_ref[...] = acc + b_ref[...]


def _tiled_kernel(x_ref, w_ref, b_ref, o_ref):
    # x_ref: (tm, tk), w_ref: (tn, tk), b_ref: (1, tn), o_ref: (tm, tn) f32.
    # Output block index is constant across k (reduction axis, last in grid),
    # so o_ref stays resident in VMEM: accumulate into it directly.
    k = pl.program_id(2)

    @pl.when(k == 0)
    def _():
        o_ref[...] = jnp.zeros_like(o_ref)

    o_ref[...] += jax.lax.dot_general(x_ref[...], w_ref[...],
                                      dimension_numbers=_NT_DIMS,
                                      preferred_element_type=jnp.float32)

    @pl.when(k == pl.num_programs(2) - 1)
    def _():
        o_ref[...] += b_ref[...]


# ---------------------------------------------------------------------------
# Wrappers
# ---------------------------------------------------------------------------

def _select_tiles(B8, D_out, D_in, in_bytes, budget):
    """Pick (tm, tn, tk) — biggest tiles that fit the per-chip VMEM budget."""
    tk = min(1024 if in_bytes == 2 else 512, _round_up(D_in, _LANE))
    # Whole batch resident => weight streams from HBM exactly once.
    tm = B8 if B8 <= 1024 else 512
    tn = min(512, _round_up(D_out, _LANE))

    # Shrink to fit VMEM budget: reduction dim first, never M/N first.
    while _footprint_bytes(tm, tn, tk, in_bytes) > budget:
        if tk > _LANE:
            tk //= 2
        elif tn > _LANE:
            tn //= 2
        elif tm > _SUBLANE:
            tm = max(_SUBLANE, _round_up(tm // 2, _SUBLANE))
        else:
            break

    # v7x: ensure >= 2 parallel (i, j) blocks so both TensorCores get work.
    def n_parallel(tm_, tn_):
        return _cdiv(B8, tm_) * _cdiv(D_out, tn_)
    while n_parallel(tm, tn) < 2 and tn > _LANE:
        tn //= 2
    while n_parallel(tm, tn) < 2 and tm > _SUBLANE:
        tm = max(_SUBLANE, _round_up(tm // 2, _SUBLANE))
    return tm, tn, tk


def _dense_single_block(xc, wc, b2d, total_bytes):
    B, D_in = xc.shape
    D_out = wc.shape[0]
    in_bytes = xc.dtype.itemsize
    cost = pl.CostEstimate(
        flops=2 * B * D_in * D_out,
        transcendentals=0,
        bytes_accessed=(B * D_in + D_out * D_in) * in_bytes + B * D_out * 4)
    return pl.pallas_call(
        _single_block_kernel,
        out_shape=jax.ShapeDtypeStruct((B, D_out), jnp.float32),
        in_specs=[
            pl.BlockSpec(memory_space=_VMEM),   # x
            pl.BlockSpec(memory_space=_VMEM),   # weight (D_out, D_in)
            pl.BlockSpec(memory_space=_VMEM),   # bias (1, D_out)
        ],
        out_specs=pl.BlockSpec(memory_space=_VMEM),
        compiler_params=pltpu.CompilerParams(
            vmem_limit_bytes=int(total_bytes + 4 * _MIB)),
        cost_estimate=cost,
    )(xc, wc, b2d)


def _dense_tiled(xc, wc, b2d, tm, tn, tk, vmem_limit):
    B_pad, D_in_pad = xc.shape
    D_out_pad = wc.shape[0]
    grid = (B_pad // tm, D_out_pad // tn, D_in_pad // tk)   # reduction (K) last
    in_bytes = xc.dtype.itemsize
    cost = pl.CostEstimate(
        flops=2 * B_pad * D_in_pad * D_out_pad,
        transcendentals=0,
        bytes_accessed=(B_pad * D_in_pad * in_bytes * grid[1]
                        + D_out_pad * D_in_pad * in_bytes * grid[0]
                        + B_pad * D_out_pad * 4))
    return pl.pallas_call(
        _tiled_kernel,
        out_shape=jax.ShapeDtypeStruct((B_pad, D_out_pad), jnp.float32),
        grid=grid,
        in_specs=[
            pl.BlockSpec((tm, tk), lambda i, j, k: (i, k)),   # x
            pl.BlockSpec((tn, tk), lambda i, j, k: (j, k)),   # weight
            pl.BlockSpec((1, tn), lambda i, j, k: (0, j)),    # bias
        ],
        out_specs=pl.BlockSpec((tm, tn), lambda i, j, k: (i, j)),
        compiler_params=pltpu.CompilerParams(
            dimension_semantics=("parallel", "parallel", "arbitrary"),
            vmem_limit_bytes=vmem_limit,
        ),
        cost_estimate=cost,
    )(xc, wc, b2d)


@functools.partial(jax.jit, static_argnames=("use_bf16",))
def dense_forward(x, weight, bias, *, use_bf16=False):
    """Forward pass of `Dense`.

    x: (B, D_in); weight: (D_out, D_in) (PyTorch nn.Linear layout);
    bias: (D_out,).  Returns (B, D_out, 1, 1) float32.
    """
    B, D_in = x.shape
    D_out = weight.shape[0]

    in_dtype = jnp.bfloat16 if use_bf16 else jnp.float32
    in_bytes = 2 if use_bf16 else 4
    # Cast at the pallas_call boundary so the kernel DMAs the narrow dtype.
    xc = x.astype(in_dtype)
    wc = weight.astype(in_dtype)
    b2d = bias.reshape(1, D_out).astype(jnp.float32)

    total_bytes = in_bytes * (B * D_in + D_out * D_in) + 4 * (B * D_out + D_out)

    if total_bytes <= _SINGLE_BLOCK_MAX_BYTES:
        out = _dense_single_block(xc, wc, b2d, total_bytes)
    else:
        phys_vmem = _physical_vmem_bytes()
        budget = min(phys_vmem // 2, 32 * _MIB)
        B8 = _round_up(B, _SUBLANE)
        tm, tn, tk = _select_tiles(B8, D_out, D_in, in_bytes, budget)

        B_pad = _round_up(B8, tm)
        D_out_pad = _round_up(D_out, tn)
        D_in_pad = _round_up(D_in, tk)
        # Zero-pad ragged dims to tile multiples (zeros don't change x @ w.T).
        if (B_pad, D_in_pad) != (B, D_in):
            xc = jnp.pad(xc, ((0, B_pad - B), (0, D_in_pad - D_in)))
        if (D_out_pad, D_in_pad) != (D_out, D_in):
            wc = jnp.pad(wc, ((0, D_out_pad - D_out), (0, D_in_pad - D_in)))
        if D_out_pad != D_out:
            b2d = jnp.pad(b2d, ((0, 0), (0, D_out_pad - D_out)))

        vmem_limit = int(min(_footprint_bytes(tm, tn, tk, in_bytes) + 8 * _MIB,
                             phys_vmem - 8 * _MIB))
        out = _dense_tiled(xc, wc, b2d, tm, tn, tk, vmem_limit)
        if (B_pad, D_out_pad) != (B, D_out):
            out = out[:B, :D_out]

    # Glue: add the (1, 1) feature-map dims, same as `[..., None, None]`.
    return out[..., None, None]


# ---------------------------------------------------------------------------
# Self-test
# ---------------------------------------------------------------------------

if __name__ == "__main__":
    key = jax.random.PRNGKey(0)

    def make_problem(key, B, D_in, D_out):
        kx, kw, kb = jax.random.split(key, 3)
        bound = 1.0 / (D_in ** 0.5)
        x = jax.random.normal(kx, (B, D_in), dtype=jnp.float32)
        w = jax.random.uniform(kw, (D_out, D_in), minval=-bound, maxval=bound,
                               dtype=jnp.float32)
        b = jax.random.uniform(kb, (D_out,), minval=-bound, maxval=bound,
                               dtype=jnp.float32)
        ref = (jax.lax.dot_general(x, w, dimension_numbers=_NT_DIMS,
                                   precision=jax.lax.Precision.HIGHEST)
               + b)[..., None, None]
        return x, w, b, ref

    # --- Case 1: spec-sized problem (batch=2, input_dim=32, output_dim=64),
    #             single-block path ---
    k1, k2, k3, key = jax.random.split(key, 4)
    x1, w1, b1, ref1 = make_problem(k1, 2, 32, 64)
    y1 = jax.block_until_ready(dense_forward(x1, w1, b1))
    assert y1.shape == (2, 64, 1, 1), y1.shape
    assert jnp.allclose(y1, ref1, atol=1e-4, rtol=1e-4), "single-block mismatch"

    # --- Case 2: tiled (M, N, K) path, f32 ---
    x2, w2, b2, ref2 = make_problem(k2, 256, 2048, 4096)
    y2 = jax.block_until_ready(dense_forward(x2, w2, b2))
    assert y2.shape == (256, 4096, 1, 1), y2.shape
    assert jnp.allclose(y2, ref2, atol=5e-3, rtol=5e-3), "tiled f32 mismatch"

    # --- Case 3: tiled path, bf16 inputs / f32 accumulate (MXU fast path) ---
    y3 = jax.block_until_ready(dense_forward(x2, w2, b2, use_bf16=True))
    assert jnp.allclose(y3, ref2, atol=5e-2, rtol=5e-2), "tiled bf16 mismatch"

    # --- Case 4: ragged dims (exercise wrapper-side padding of B/D_in/D_out) ---
    x4, w4, b4, ref4 = make_problem(k3, 100, 2100, 1541)
    y4 = jax.block_until_ready(dense_forward(x4, w4, b4))
    assert y4.shape == (100, 1541, 1, 1), y4.shape
    assert jnp.allclose(y4, ref4, atol=5e-3, rtol=5e-3), "ragged/padded mismatch"

    print("KERNEL_OK")
</pallas_src>

<mosaic_0001>
module attributes {stable_mosaic.version = 11 : i64} {
  func.func @_single_block_kernel(%arg0: memref<2x32xf32, #tpu.memory_space<vmem>>, %arg1: memref<64x32xf32, #tpu.memory_space<vmem>>, %arg2: memref<1x64xf32, #tpu.memory_space<vmem>>, %arg3: memref<2x64xf32, #tpu.memory_space<vmem>>) attributes {dimension_semantics = [], scalar_prefetch = 0 : i64, scratch_operands = 0 : i64, tpu.core_type = #tpu.core_type<tc>} {
    %c0 = arith.constant 0 : index
    %c0_0 = arith.constant 0 : index
    %0 = vector.load %arg0[%c0, %c0_0] : memref<2x32xf32, #tpu.memory_space<vmem>>, vector<2x32xf32>
    %c0_1 = arith.constant 0 : index
    %c0_2 = arith.constant 0 : index
    %1 = vector.load %arg1[%c0_1, %c0_2] : memref<64x32xf32, #tpu.memory_space<vmem>>, vector<64x32xf32>
    %cst = arith.constant dense<0.000000e+00> : vector<2x64xf32>
    %2 = tpu.matmul %0, %1, %cst {dimension_numbers = #tpu.dot_dimension_numbers<[1], [1], [0], [0], [0, 0, 1, 0], [], []>} : vector<2x32xf32>, vector<64x32xf32>, vector<2x64xf32> -> vector<2x64xf32>
    %c0_3 = arith.constant 0 : index
    %c0_4 = arith.constant 0 : index
    %3 = vector.load %arg2[%c0_3, %c0_4] : memref<1x64xf32, #tpu.memory_space<vmem>>, vector<1x64xf32>
    %4 = vector.broadcast %3 : vector<1x64xf32> to vector<2x64xf32>
    %5 = arith.addf %2, %4 : vector<2x64xf32>
    %c0_5 = arith.constant 0 : index
    %c0_6 = arith.constant 0 : index
    %6 = vector.load %arg3[%c0_5, %c0_6] : memref<2x64xf32, #tpu.memory_space<vmem>>, vector<2x64xf32>
    tpu.vector_store %arg3[%c0_5, %c0_6], %5 {strides = array<i32>} : memref<2x64xf32, #tpu.memory_space<vmem>>, vector<2x64xf32>,
    return
  }
}

</mosaic_0001>

<bundles_post_ra>
// kernel: dense_forward.1
= control target key start
LH: loop header
LB: loop body
LE: loop exit
PB: predicated region body
PF: predicated region fallthrough
CT: control target
= control target key end

     0   :  { %vm31_vm0 = vcmask 261120   ;;  %v227_v2 = vmov 0.0|0.0   ;;  %vm228_vm2 = vmmov 0   ;;  %v229_v5 = vmov 0.0   ;;  %s308_s0 = inlined_call_operand.vmem [shape: f32[2,32], index: 0, kind: input, shape index: {}]   ;;  %s309_s1 = inlined_call_operand.vmem [shape: f32[64,32], index: 1, kind: input, shape index: {}]   ;;  %s310_s2 = inlined_call_operand.vmem [shape: f32[1,64], index: 2, kind: input, shape index: {}]   ;;  %s311_s3 = inlined_call_operand.hbm [shape: f32[2,64], index: 3, kind: output, shape index: {}]  }
   0x1   :  { %v16_v0 = vld [vmem:[%s309_s1] sm:$0xff]  ;;  %v17_v1 = vld [vmem:[%s309_s1 + $0x8] sm:$0xff]  ;;  %183 = vmatprep.subr.bf16.mxu0 %v227_v2  ;;  %vm259_vm1 = vmpackc.low %vm31_vm0, %vm31_vm0  ;;  %180 = vmatprep.mubr.msk.f32.mxu0 %vm228_vm2, %v229_v5 }
   0x2   :  { %v184_v3 = vpack.c.bf16 %v17_v1, %v16_v0 }
   0x4   :  { %186 = vmatpush3.bf16.xpose.msk.msra.mxu0 %vm259_vm1, %v184_v3 }
   0x5   :  { %8 = vsyncpa [#allocation3], 0  ;;  %187 = vmatprep.subr.bf16.mxu0 %v227_v2  ;;  %v18_v6 = vld [vmem:[%s309_s1 + $0x10] sm:$0xff]  ;;  %v19_v7 = vld [vmem:[%s309_s1 + $0x18] sm:$0xff]  ;;  %s230_s5 = smov [#allocation2]   ;;  %vm129_vm3 = vcmask 517120  }
   0x6   :  { %v188_v8 = vpack.c.bf16 %v19_v7, %v18_v6  ;;  %v20_v9 = vld [vmem:[%s309_s1 + $0x20] sm:$0xff]  ;;  %v21_v10 = vld [vmem:[%s309_s1 + $0x28] sm:$0xff]  ;;  %v22_v12 = vld [vmem:[%s309_s1 + $0x30] sm:$0xff]  ;;  %s137_s6 = sshll.u32 %s230_s5, 4  ;;  %s138_s6 = int_to_ptr.vmem [resolvable:$true] %s137_s6 }
   0x7   :  { %v192_v11 = vpack.c.bf16 %v21_v10, %v20_v9  ;;  %v23_v13 = vld [vmem:[%s309_s1 + $0x38] sm:$0xff]  ;;  %v15_v15 = vld [vmem:[%s308_s0] sm:$0x3]  ;;  %s203_s1 = scalar_lea.vmem %s138_s6, 32  ;;  %p208_p1 = scmp.lt.s32.totalorder %s138_s6, %s138_s6 }
   0x8   :  { %v196_v14 = vpack.c.bf16 %v23_v13, %v22_v12  ;;  %v145_v16 = vld [vmem:[%s310_s2] ss:$0 sm:$0xff]  ;;  %p204_p0 = scmp.ne.s32.totalorder %s138_s6, %s203_s1  ;;  %p209_p2 = scmp.lt.s32.totalorder %s203_s1, %s203_s1 }
   0xa   :  { %p210_p3 = por %p209_p2, %p208_p1 }
   0xc   :  { %190 = vmatpush3.bf16.xpose.msk.msra.mxu0 %vm259_vm1, %v188_v8  ;;  %p211_p4 = pnand %p210_p3, %p204_p0 }
   0xd   :  { %191 = vmatprep.subr.bf16.mxu0 %v227_v2 }
  0x14   :  { %194 = vmatpush3.bf16.xpose.msk.msra.mxu0 %vm259_vm1, %v192_v11 }
  0x15   :  { %195 = vmatprep.subr.bf16.mxu0 %v227_v2 }
  0x1c   :  { %198 = vmatpush3.bf16.xpose.msk.msra.mxu0 %vm259_vm1, %v196_v14 }
  0x23   :  { %181 = vmatmul.mubr.msk.f32.vlgmr.msra.gmra.mrb[0].mxu0 %vm31_vm0, %v15_v15 }
  0xf6   :  { %v125_v17 = vpop.f32.mrb[0].mxu0 }
  0xf7   :  { %v126_v18 = vadd.f32 %v145_v16, %v125_v17  ;;  %v182_v19 = vpop.f32.mrb[1].mxu0 }
  0xf9   :  { %130 = vst.msk [vmem:[#allocation2] sm:$0x3] %vm129_vm3, %v126_v18 }
  0xfa   :  { %214 = shalt.err (!%p211_p4)
}
  0xfb   :  { %s215_s8 = scalar_lea.hbm %s311_s3, 32 }
  0xfc   :  { %p216_p5 = scmp.ne.s32.totalorder %s311_s3, %s215_s8  ;;  %p219_p6 = scmp.lt.u32.totalorder %s215_s8, %s311_s3 }
  0xfe   :  { %p221_p7 = pnand %p219_p6, %p216_p5 }
 0x100   :  { %224 = shalt.err (!%p221_p7)
}
 0x101   :  { %140 = dma.vmem_to_hbm [thread:$0]  %s138_s6, 32, %s311_s3, [#allocation3]  }
 0x102   :  { %225 = dma.done.wait [#allocation3], 32  }
 0x103   :  { %226 = vsyncadd [#allocation3], 4294967264 }
 0x104   :  { %144 = vsyncpa [#allocation3], 1 }

</bundles_post_ra>
